<compile_context>
chip_gen: v5e
topology: v5e:2x2
jax: 0.10.0
libtpu: 0.0.40
codegen_flags: <defaults>
</compile_context>

<pallas_src>
import numpy as np
import jax
import jax.numpy as jnp
from jax import lax
from jax.experimental import pallas as pl
from jax.experimental.pallas import tpu as pltpu


# ---------------------------------------------------------------------------
# static layout helpers (plain numpy, evaluated once at build time)
# ---------------------------------------------------------------------------

def _bit_reversal_permutation(n_bits):
    L = 1 << n_bits
    perm = np.zeros(L, dtype=np.int64)
    for p in range(L):
        v, b = p, 0
        for _ in range(n_bits):
            b = (b << 1) | (v & 1)
            v >>= 1
        perm[p] = b
    return perm


def _half_slot_sites(start, count, l_pad, perm):
    """Global site index (or -1 for identity padding) stored in each lane slot.

    Slot p holds site halfsites[bitrev(p)], so that the in-kernel
    "lane p combines with lane p+h" fold computes M_start @ ... @ M_{start+count-1}.
    """
    sites = np.full(l_pad, -1, dtype=np.int64)
    sites[:count] = np.arange(start, start + count)
    return sites[perm]


# ---------------------------------------------------------------------------
# Pallas kernel
# ---------------------------------------------------------------------------

def _restt_kernel(x_ref, cores_ref, ocore_ref, aw_ref, y_ref):
    # x_ref:     (2B, L)      VMEM  pixel value per (chain-half*B + b, lane slot)
    # cores_ref: (8, 2B, L)   VMEM  row k = s*4 + (d*2+e); s=0 residual core A,
    #                               s=1 data core B; pre-broadcast over batch
    # ocore_ref: (4, B, OUTP) VMEM  output core rows (d*2+e), batch-broadcast,
    #                               zero-padded beyond out_dim
    # aw_ref:    (4,)         SMEM  [alpha0, alpha1, omega0, omega1]
    # y_ref:     (B, OUTP)    VMEM
    x = x_ref[...]                              # (2B, L)
    twoB, L = x.shape
    B = twoB // 2

    # Per-site residual transfer matrices M_i[b] = A_i + x[b,i] * B_i, as four
    # lane-dense (2B, L) arrays (left half on sublanes [0,B), right on [B,2B)).
    m00 = cores_ref[0] + x * cores_ref[4]
    m01 = cores_ref[1] + x * cores_ref[5]
    m10 = cores_ref[2] + x * cores_ref[6]
    m11 = cores_ref[3] + x * cores_ref[7]

    # Log-depth ordered chain product.  Sites were placed in bit-reversed order
    # by the wrapper, so combining lane p with lane p+h at each level gives the
    # ordered product over each chain half (padding slots hold identity).
    # Everything stays full 128-lane width; the partner operand is fetched with
    # an XLU lane rotation (shift = L-h ≡ -h mod L), so the hot loop is pure
    # full-width VALU work with no lane-offset relayouts.  Only lanes [0, h)
    # are meaningful after each level; the junk above is never read.
    h = L // 2
    while h >= 1:
        s = L - h                                # partner lane p+h lands on lane p
        r00 = pltpu.roll(m00, shift=s, axis=1)
        r01 = pltpu.roll(m01, shift=s, axis=1)
        r10 = pltpu.roll(m10, shift=s, axis=1)
        r11 = pltpu.roll(m11, shift=s, axis=1)
        n00 = m00 * r00 + m01 * r10
        n01 = m00 * r01 + m01 * r11
        n10 = m10 * r00 + m11 * r10
        n11 = m10 * r01 + m11 * r11
        m00, m01, m10, m11 = n00, n01, n10, n11
        h //= 2

    # Lane 0 now holds the ordered half-chain products; discard the junk lanes.
    q00 = m00[:, 0:1]
    q01 = m01[:, 0:1]
    q10 = m10[:, 0:1]
    q11 = m11[:, 0:1]
    pL00, pR00 = q00[:B], q00[B:]                # P_L = prod sites [0, c)
    pL01, pR01 = q01[:B], q01[B:]                # P_R = prod sites [c, N)
    pL10, pR10 = q10[:B], q10[B:]
    pL11, pR11 = q11[:B], q11[B:]

    a0 = aw_ref[0]                               # alpha (left boundary), SMEM scalars
    a1 = aw_ref[1]
    w0 = aw_ref[2]                               # omega (right boundary)
    w1 = aw_ref[3]

    l0 = a0 * pL00 + a1 * pL10                   # l = alpha @ P_L        (B, 1)
    l1 = a0 * pL01 + a1 * pL11
    r0 = pR00 * w0 + pR01 * w1                   # r = P_R @ omega^T      (B, 1)
    r1 = pR10 * w0 + pR11 * w1

    y = ((l0 * r0) * ocore_ref[0] + (l0 * r1) * ocore_ref[1]
         + (l1 * r0) * ocore_ref[2] + (l1 * r1) * ocore_ref[3])
    y_ref[...] = y.astype(y_ref.dtype)


# ---------------------------------------------------------------------------
# parameters + forward builder
# ---------------------------------------------------------------------------

def init_restt_params(key, *, lengthX=14, lengthY=14, in_bond=2, hidden_bond=2,
                      out_dim=10, std=0.01):
    assert in_bond == 2 and hidden_bond == 2, "reconstruction assumes 2x2 cores"
    N = lengthX * lengthY
    D = hidden_bond
    k1, k2, k3 = jax.random.split(key, 3)
    eye = jnp.broadcast_to(jnp.eye(D, dtype=jnp.float32), (N, D, D))
    core_res = eye + std * jax.random.normal(k1, (N, D, D), dtype=jnp.float32)
    core_lin = std * jax.random.normal(k2, (N, D, D), dtype=jnp.float32)
    cores = jnp.stack([core_res, core_lin], axis=1)            # (N, 2, D, D)
    alpha = jnp.ones((1, D), jnp.float32)
    omega = jnp.ones((1, D), jnp.float32)
    ocore = std * jax.random.normal(k3, (D * D, out_dim), dtype=jnp.float32)
    return dict(cores=cores, alpha=alpha, omega=omega, ocore=ocore)


def build_restt_forward(params, *, batch):
    """Builds the jitted forward; all param-only work is precomputed here once."""
    cores = params["cores"]            # (N, 2, D, D)
    alpha = params["alpha"]
    omega = params["omega"]
    ocore = params["ocore"]            # (D*D, out_dim)
    N, S, D, _ = cores.shape
    assert S == 2 and D == 2
    out_dim = ocore.shape[-1]
    out_pad = 128 * int(pl.cdiv(out_dim, 128))

    # ---- static lane layout (bit-reversed site placement per chain half) ----
    c = N // 2
    half_len = max(c, N - c, 1)
    n_bits = max(int(np.ceil(np.log2(half_len))), 0)
    l_pad = 1 << n_bits
    perm = _bit_reversal_permutation(n_bits)
    slots = np.stack([_half_slot_sites(0, c, l_pad, perm),
                      _half_slot_sites(c, N - c, l_pad, perm)], axis=0)   # (2, L)
    x_idx = np.where(slots >= 0, slots, 0)                                # (2, L)
    valid = jnp.asarray((slots >= 0).astype(np.float32))                  # (2, L)

    # ---- param-only device arrays (hoisted out of the per-call path) --------
    g = cores[x_idx.reshape(-1)].reshape(2, l_pad, 2, D, D)
    g = jnp.moveaxis(g, 1, -1)                                 # (2, 2, D, D, L)
    eye = jnp.eye(D, dtype=jnp.float32)[None, :, :, None]      # (1, D, D, 1)
    v = valid[:, None, None, :]                                # (2, 1, 1, L)
    a = g[:, 0] * v + eye * (1.0 - v)                          # residual: pad -> I
    b = g[:, 1] * v                                            # data core: pad -> 0
    ab = jnp.concatenate([a.reshape(2, D * D, l_pad),
                          b.reshape(2, D * D, l_pad)], axis=1)  # (2, 8, L)
    ab = jnp.moveaxis(ab, 1, 0)                                 # (8, 2, L)
    cores_bc = jnp.broadcast_to(ab[:, :, None, :], (2 * D * D, 2, batch, l_pad))
    cores_bc = cores_bc.reshape(2 * D * D, 2 * batch, l_pad)    # (8, 2B, L)

    ocore_pad = jnp.zeros((D * D, out_pad), jnp.float32).at[:, :out_dim].set(ocore)
    ocore_bc = jnp.broadcast_to(ocore_pad[:, None, :], (D * D, batch, out_pad))
    ocore_bc = jnp.asarray(ocore_bc)                            # (4, B, OUTP)

    aw = jnp.concatenate([alpha.reshape(-1),
                          omega.reshape(-1)]).astype(jnp.float32)   # (4,)

    # ---- pallas_call (grid=(1,): whole problem is one ~24 KiB tile) ---------
    grid_spec = pltpu.PrefetchScalarGridSpec(
        num_scalar_prefetch=0,
        grid=(1,),
        in_specs=[
            pl.BlockSpec((2 * batch, l_pad), lambda i: (0, 0)),
            pl.BlockSpec((2 * D * D, 2 * batch, l_pad), lambda i: (0, 0, 0)),
            pl.BlockSpec((D * D, batch, out_pad), lambda i: (0, 0, 0)),
            pl.BlockSpec(memory_space=pltpu.MemorySpace.SMEM),
        ],
        out_specs=pl.BlockSpec((batch, out_pad), lambda i: (0, 0)),
    )
    restt_call = pl.pallas_call(
        _restt_kernel,
        out_shape=jax.ShapeDtypeStruct((batch, out_pad), jnp.float32),
        grid_spec=grid_spec,
        compiler_params=pltpu.CompilerParams(
            dimension_semantics=("arbitrary",),
            vmem_limit_bytes=16 * 1024 * 1024,
        ),
    )

    @jax.jit
    def _forward(x_nchw, cores_bc_, ocore_bc_, aw_):
        B = x_nchw.shape[0]
        xf = x_nchw.reshape(B, N).astype(jnp.float32)
        # per-call work is only the pixel gather into bit-reversed lane slots
        x_lanes = jnp.transpose(xf[:, x_idx], (1, 0, 2)).reshape(2 * B, l_pad)
        y = restt_call(x_lanes, cores_bc_, ocore_bc_, aw_)
        # mirrors `x.view(-1, self.out_dim)` in the PyTorch module
        return y[:, :out_dim].reshape(-1, out_dim)

    def forward(x_nchw):
        assert x_nchw.shape[0] == batch and x_nchw.shape[1] == 1
        assert x_nchw.shape[2] * x_nchw.shape[3] == N
        return _forward(x_nchw, cores_bc, ocore_bc, aw)

    return forward


# ---------------------------------------------------------------------------
# pure-JAX reference (sequential sweeps) for a correctness check
# ---------------------------------------------------------------------------

@jax.jit
def restt_reference(x_nchw, params):
    cores, alpha, omega, ocore = (params["cores"], params["alpha"],
                                  params["omega"], params["ocore"])
    N, S, D, _ = cores.shape
    out_dim = ocore.shape[-1]
    B = x_nchw.shape[0]
    xf = x_nchw.reshape(B, N).astype(jnp.float32)
    M = cores[None, :, 0] + xf[:, :, None, None] * cores[None, :, 1]   # (B,N,D,D)
    c = N // 2
    l = jnp.broadcast_to(alpha, (B, D))
    l = lax.fori_loop(0, c, lambda i, v: jnp.einsum("bd,bde->be", v, M[:, i]), l)
    r = jnp.broadcast_to(omega, (B, D))
    r = lax.fori_loop(0, N - c,
                      lambda k, v: jnp.einsum("bde,be->bd", M[:, N - 1 - k], v), r)
    O = ocore.reshape(D, D, out_dim)
    y = jnp.einsum("bd,be,deo->bo", l, r, O)
    return y.reshape(-1, out_dim)


if __name__ == "__main__":
    key = jax.random.PRNGKey(0)
    kx, kp = jax.random.split(key)

    lengthX = lengthY = 14     # module defaults (kernel_size=14 covers the image)
    out_dim = 10
    batch = 8

    # NCHW input, pixel values in [0, 1) like a normalized grayscale image.
    x = jax.random.uniform(kx, (batch, 1, lengthX, lengthY), dtype=jnp.float32)
    params = init_restt_params(kp, lengthX=lengthX, lengthY=lengthY,
                               in_bond=2, hidden_bond=2, out_dim=out_dim, std=0.01)

    forward = build_restt_forward(params, batch=batch)
    y = forward(x)
    jax.block_until_ready(y)
    assert y.shape == (batch, out_dim), y.shape
    assert bool(jnp.all(jnp.isfinite(y)))

    y_ref = restt_reference(x, params)
    assert bool(jnp.allclose(y, y_ref, rtol=1e-3, atol=1e-4)), float(
        jnp.max(jnp.abs(y - y_ref)))

    print("KERNEL_OK")
</pallas_src>

<mosaic_0001>
module attributes {stable_mosaic.version = 11 : i64} {
  func.func @_restt_kernel(%arg0: i32, %arg1: memref<16x128xf32, #tpu.memory_space<vmem>>, %arg2: memref<8x16x128xf32, #tpu.memory_space<vmem>>, %arg3: memref<4x8x128xf32, #tpu.memory_space<vmem>>, %arg4: memref<4xf32, #tpu.memory_space<smem>>, %arg5: memref<8x128xf32, #tpu.memory_space<vmem>>) attributes {dimension_semantics = [#tpu.dimension_semantics<arbitrary>], iteration_bounds = array<i64: 1>, scalar_prefetch = 0 : i64, scratch_operands = 0 : i64, tpu.core_type = #tpu.core_type<tc>, window_params = [{pipeline_mode = #tpu.pipeline_mode<synchronous>, transform_indices = @transform_0, window_bounds = array<i64: 16, 128>}, {pipeline_mode = #tpu.pipeline_mode<synchronous>, transform_indices = @transform_1, window_bounds = array<i64: 8, 16, 128>}, {pipeline_mode = #tpu.pipeline_mode<synchronous>, transform_indices = @transform_2, window_bounds = array<i64: 4, 8, 128>}, {transform_indices = @transform_3, window_bounds = array<i64: 4>}, {pipeline_mode = #tpu.pipeline_mode<synchronous>, transform_indices = @transform_4, window_bounds = array<i64: 8, 128>}]} {
    %c0 = arith.constant 0 : index
    %c0_0 = arith.constant 0 : index
    %0 = vector.load %arg1[%c0, %c0_0] : memref<16x128xf32, #tpu.memory_space<vmem>>, vector<16x128xf32>
    %c0_1 = arith.constant 0 : index
    %c0_2 = arith.constant 0 : index
    %c0_3 = arith.constant 0 : index
    %1 = vector.load %arg2[%c0_1, %c0_2, %c0_3] : memref<8x16x128xf32, #tpu.memory_space<vmem>>, vector<1x16x128xf32>
    %2 = vector.shape_cast %1 : vector<1x16x128xf32> to vector<16x128xf32>
    %c4 = arith.constant 4 : index
    %c0_4 = arith.constant 0 : index
    %c0_5 = arith.constant 0 : index
    %3 = vector.load %arg2[%c4, %c0_4, %c0_5] : memref<8x16x128xf32, #tpu.memory_space<vmem>>, vector<1x16x128xf32>
    %4 = vector.shape_cast %3 : vector<1x16x128xf32> to vector<16x128xf32>
    %5 = arith.mulf %0, %4 : vector<16x128xf32>
    %6 = arith.addf %2, %5 : vector<16x128xf32>
    %c1 = arith.constant 1 : index
    %c0_6 = arith.constant 0 : index
    %c0_7 = arith.constant 0 : index
    %7 = vector.load %arg2[%c1, %c0_6, %c0_7] : memref<8x16x128xf32, #tpu.memory_space<vmem>>, vector<1x16x128xf32>
    %8 = vector.shape_cast %7 : vector<1x16x128xf32> to vector<16x128xf32>
    %c5 = arith.constant 5 : index
    %c0_8 = arith.constant 0 : index
    %c0_9 = arith.constant 0 : index
    %9 = vector.load %arg2[%c5, %c0_8, %c0_9] : memref<8x16x128xf32, #tpu.memory_space<vmem>>, vector<1x16x128xf32>
    %10 = vector.shape_cast %9 : vector<1x16x128xf32> to vector<16x128xf32>
    %11 = arith.mulf %0, %10 : vector<16x128xf32>
    %12 = arith.addf %8, %11 : vector<16x128xf32>
    %c2 = arith.constant 2 : index
    %c0_10 = arith.constant 0 : index
    %c0_11 = arith.constant 0 : index
    %13 = vector.load %arg2[%c2, %c0_10, %c0_11] : memref<8x16x128xf32, #tpu.memory_space<vmem>>, vector<1x16x128xf32>
    %14 = vector.shape_cast %13 : vector<1x16x128xf32> to vector<16x128xf32>
    %c6 = arith.constant 6 : index
    %c0_12 = arith.constant 0 : index
    %c0_13 = arith.constant 0 : index
    %15 = vector.load %arg2[%c6, %c0_12, %c0_13] : memref<8x16x128xf32, #tpu.memory_space<vmem>>, vector<1x16x128xf32>
    %16 = vector.shape_cast %15 : vector<1x16x128xf32> to vector<16x128xf32>
    %17 = arith.mulf %0, %16 : vector<16x128xf32>
    %18 = arith.addf %14, %17 : vector<16x128xf32>
    %c3 = arith.constant 3 : index
    %c0_14 = arith.constant 0 : index
    %c0_15 = arith.constant 0 : index
    %19 = vector.load %arg2[%c3, %c0_14, %c0_15] : memref<8x16x128xf32, #tpu.memory_space<vmem>>, vector<1x16x128xf32>
    %20 = vector.shape_cast %19 : vector<1x16x128xf32> to vector<16x128xf32>
    %c7 = arith.constant 7 : index
    %c0_16 = arith.constant 0 : index
    %c0_17 = arith.constant 0 : index
    %21 = vector.load %arg2[%c7, %c0_16, %c0_17] : memref<8x16x128xf32, #tpu.memory_space<vmem>>, vector<1x16x128xf32>
    %22 = vector.shape_cast %21 : vector<1x16x128xf32> to vector<16x128xf32>
    %23 = arith.mulf %0, %22 : vector<16x128xf32>
    %24 = arith.addf %20, %23 : vector<16x128xf32>
    %c64_i32 = arith.constant 64 : i32
    %25 = tpu.dynamic_rotate %6 by %c64_i32 dim 1 : vector<16x128xf32>, i32 -> vector<16x128xf32>
    %c64_i32_18 = arith.constant 64 : i32
    %26 = tpu.dynamic_rotate %12 by %c64_i32_18 dim 1 : vector<16x128xf32>, i32 -> vector<16x128xf32>
    %c64_i32_19 = arith.constant 64 : i32
    %27 = tpu.dynamic_rotate %18 by %c64_i32_19 dim 1 : vector<16x128xf32>, i32 -> vector<16x128xf32>
    %c64_i32_20 = arith.constant 64 : i32
    %28 = tpu.dynamic_rotate %24 by %c64_i32_20 dim 1 : vector<16x128xf32>, i32 -> vector<16x128xf32>
    %29 = arith.mulf %6, %25 : vector<16x128xf32>
    %30 = arith.mulf %12, %27 : vector<16x128xf32>
    %31 = arith.addf %29, %30 : vector<16x128xf32>
    %32 = arith.mulf %6, %26 : vector<16x128xf32>
    %33 = arith.mulf %12, %28 : vector<16x128xf32>
    %34 = arith.addf %32, %33 : vector<16x128xf32>
    %35 = arith.mulf %18, %25 : vector<16x128xf32>
    %36 = arith.mulf %24, %27 : vector<16x128xf32>
    %37 = arith.addf %35, %36 : vector<16x128xf32>
    %38 = arith.mulf %18, %26 : vector<16x128xf32>
    %39 = arith.mulf %24, %28 : vector<16x128xf32>
    %40 = arith.addf %38, %39 : vector<16x128xf32>
    %c96_i32 = arith.constant 96 : i32
    %41 = tpu.dynamic_rotate %31 by %c96_i32 dim 1 : vector<16x128xf32>, i32 -> vector<16x128xf32>
    %c96_i32_21 = arith.constant 96 : i32
    %42 = tpu.dynamic_rotate %34 by %c96_i32_21 dim 1 : vector<16x128xf32>, i32 -> vector<16x128xf32>
    %c96_i32_22 = arith.constant 96 : i32
    %43 = tpu.dynamic_rotate %37 by %c96_i32_22 dim 1 : vector<16x128xf32>, i32 -> vector<16x128xf32>
    %c96_i32_23 = arith.constant 96 : i32
    %44 = tpu.dynamic_rotate %40 by %c96_i32_23 dim 1 : vector<16x128xf32>, i32 -> vector<16x128xf32>
    %45 = arith.mulf %31, %41 : vector<16x128xf32>
    %46 = arith.mulf %34, %43 : vector<16x128xf32>
    %47 = arith.addf %45, %46 : vector<16x128xf32>
    %48 = arith.mulf %31, %42 : vector<16x128xf32>
    %49 = arith.mulf %34, %44 : vector<16x128xf32>
    %50 = arith.addf %48, %49 : vector<16x128xf32>
    %51 = arith.mulf %37, %41 : vector<16x128xf32>
    %52 = arith.mulf %40, %43 : vector<16x128xf32>
    %53 = arith.addf %51, %52 : vector<16x128xf32>
    %54 = arith.mulf %37, %42 : vector<16x128xf32>
    %55 = arith.mulf %40, %44 : vector<16x128xf32>
    %56 = arith.addf %54, %55 : vector<16x128xf32>
    %c112_i32 = arith.constant 112 : i32
    %57 = tpu.dynamic_rotate %47 by %c112_i32 dim 1 : vector<16x128xf32>, i32 -> vector<16x128xf32>
    %c112_i32_24 = arith.constant 112 : i32
    %58 = tpu.dynamic_rotate %50 by %c112_i32_24 dim 1 : vector<16x128xf32>, i32 -> vector<16x128xf32>
    %c112_i32_25 = arith.constant 112 : i32
    %59 = tpu.dynamic_rotate %53 by %c112_i32_25 dim 1 : vector<16x128xf32>, i32 -> vector<16x128xf32>
    %c112_i32_26 = arith.constant 112 : i32
    %60 = tpu.dynamic_rotate %56 by %c112_i32_26 dim 1 : vector<16x128xf32>, i32 -> vector<16x128xf32>
    %61 = arith.mulf %47, %57 : vector<16x128xf32>
    %62 = arith.mulf %50, %59 : vector<16x128xf32>
    %63 = arith.addf %61, %62 : vector<16x128xf32>
    %64 = arith.mulf %47, %58 : vector<16x128xf32>
    %65 = arith.mulf %50, %60 : vector<16x128xf32>
    %66 = arith.addf %64, %65 : vector<16x128xf32>
    %67 = arith.mulf %53, %57 : vector<16x128xf32>
    %68 = arith.mulf %56, %59 : vector<16x128xf32>
    %69 = arith.addf %67, %68 : vector<16x128xf32>
    %70 = arith.mulf %53, %58 : vector<16x128xf32>
    %71 = arith.mulf %56, %60 : vector<16x128xf32>
    %72 = arith.addf %70, %71 : vector<16x128xf32>
    %c120_i32 = arith.constant 120 : i32
    %73 = tpu.dynamic_rotate %63 by %c120_i32 dim 1 : vector<16x128xf32>, i32 -> vector<16x128xf32>
    %c120_i32_27 = arith.constant 120 : i32
    %74 = tpu.dynamic_rotate %66 by %c120_i32_27 dim 1 : vector<16x128xf32>, i32 -> vector<16x128xf32>
    %c120_i32_28 = arith.constant 120 : i32
    %75 = tpu.dynamic_rotate %69 by %c120_i32_28 dim 1 : vector<16x128xf32>, i32 -> vector<16x128xf32>
    %c120_i32_29 = arith.constant 120 : i32
    %76 = tpu.dynamic_rotate %72 by %c120_i32_29 dim 1 : vector<16x128xf32>, i32 -> vector<16x128xf32>
    %77 = arith.mulf %63, %73 : vector<16x128xf32>
    %78 = arith.mulf %66, %75 : vector<16x128xf32>
    %79 = arith.addf %77, %78 : vector<16x128xf32>
    %80 = arith.mulf %63, %74 : vector<16x128xf32>
    %81 = arith.mulf %66, %76 : vector<16x128xf32>
    %82 = arith.addf %80, %81 : vector<16x128xf32>
    %83 = arith.mulf %69, %73 : vector<16x128xf32>
    %84 = arith.mulf %72, %75 : vector<16x128xf32>
    %85 = arith.addf %83, %84 : vector<16x128xf32>
    %86 = arith.mulf %69, %74 : vector<16x128xf32>
    %87 = arith.mulf %72, %76 : vector<16x128xf32>
    %88 = arith.addf %86, %87 : vector<16x128xf32>
    %c124_i32 = arith.constant 124 : i32
    %89 = tpu.dynamic_rotate %79 by %c124_i32 dim 1 : vector<16x128xf32>, i32 -> vector<16x128xf32>
    %c124_i32_30 = arith.constant 124 : i32
    %90 = tpu.dynamic_rotate %82 by %c124_i32_30 dim 1 : vector<16x128xf32>, i32 -> vector<16x128xf32>
    %c124_i32_31 = arith.constant 124 : i32
    %91 = tpu.dynamic_rotate %85 by %c124_i32_31 dim 1 : vector<16x128xf32>, i32 -> vector<16x128xf32>
    %c124_i32_32 = arith.constant 124 : i32
    %92 = tpu.dynamic_rotate %88 by %c124_i32_32 dim 1 : vector<16x128xf32>, i32 -> vector<16x128xf32>
    %93 = arith.mulf %79, %89 : vector<16x128xf32>
    %94 = arith.mulf %82, %91 : vector<16x128xf32>
    %95 = arith.addf %93, %94 : vector<16x128xf32>
    %96 = arith.mulf %79, %90 : vector<16x128xf32>
    %97 = arith.mulf %82, %92 : vector<16x128xf32>
    %98 = arith.addf %96, %97 : vector<16x128xf32>
    %99 = arith.mulf %85, %89 : vector<16x128xf32>
    %100 = arith.mulf %88, %91 : vector<16x128xf32>
    %101 = arith.addf %99, %100 : vector<16x128xf32>
    %102 = arith.mulf %85, %90 : vector<16x128xf32>
    %103 = arith.mulf %88, %92 : vector<16x128xf32>
    %104 = arith.addf %102, %103 : vector<16x128xf32>
    %c126_i32 = arith.constant 126 : i32
    %105 = tpu.dynamic_rotate %95 by %c126_i32 dim 1 : vector<16x128xf32>, i32 -> vector<16x128xf32>
    %c126_i32_33 = arith.constant 126 : i32
    %106 = tpu.dynamic_rotate %98 by %c126_i32_33 dim 1 : vector<16x128xf32>, i32 -> vector<16x128xf32>
    %c126_i32_34 = arith.constant 126 : i32
    %107 = tpu.dynamic_rotate %101 by %c126_i32_34 dim 1 : vector<16x128xf32>, i32 -> vector<16x128xf32>
    %c126_i32_35 = arith.constant 126 : i32
    %108 = tpu.dynamic_rotate %104 by %c126_i32_35 dim 1 : vector<16x128xf32>, i32 -> vector<16x128xf32>
    %109 = arith.mulf %95, %105 : vector<16x128xf32>
    %110 = arith.mulf %98, %107 : vector<16x128xf32>
    %111 = arith.addf %109, %110 : vector<16x128xf32>
    %112 = arith.mulf %95, %106 : vector<16x128xf32>
    %113 = arith.mulf %98, %108 : vector<16x128xf32>
    %114 = arith.addf %112, %113 : vector<16x128xf32>
    %115 = arith.mulf %101, %105 : vector<16x128xf32>
    %116 = arith.mulf %104, %107 : vector<16x128xf32>
    %117 = arith.addf %115, %116 : vector<16x128xf32>
    %118 = arith.mulf %101, %106 : vector<16x128xf32>
    %119 = arith.mulf %104, %108 : vector<16x128xf32>
    %120 = arith.addf %118, %119 : vector<16x128xf32>
    %c127_i32 = arith.constant 127 : i32
    %121 = tpu.dynamic_rotate %111 by %c127_i32 dim 1 : vector<16x128xf32>, i32 -> vector<16x128xf32>
    %c127_i32_36 = arith.constant 127 : i32
    %122 = tpu.dynamic_rotate %114 by %c127_i32_36 dim 1 : vector<16x128xf32>, i32 -> vector<16x128xf32>
    %c127_i32_37 = arith.constant 127 : i32
    %123 = tpu.dynamic_rotate %117 by %c127_i32_37 dim 1 : vector<16x128xf32>, i32 -> vector<16x128xf32>
    %c127_i32_38 = arith.constant 127 : i32
    %124 = tpu.dynamic_rotate %120 by %c127_i32_38 dim 1 : vector<16x128xf32>, i32 -> vector<16x128xf32>
    %125 = arith.mulf %111, %121 : vector<16x128xf32>
    %126 = arith.mulf %114, %123 : vector<16x128xf32>
    %127 = arith.addf %125, %126 : vector<16x128xf32>
    %128 = arith.mulf %111, %122 : vector<16x128xf32>
    %129 = arith.mulf %114, %124 : vector<16x128xf32>
    %130 = arith.addf %128, %129 : vector<16x128xf32>
    %131 = arith.mulf %117, %121 : vector<16x128xf32>
    %132 = arith.mulf %120, %123 : vector<16x128xf32>
    %133 = arith.addf %131, %132 : vector<16x128xf32>
    %134 = arith.mulf %117, %122 : vector<16x128xf32>
    %135 = arith.mulf %120, %124 : vector<16x128xf32>
    %136 = arith.addf %134, %135 : vector<16x128xf32>
    %137 = vector.extract_strided_slice %127 {offsets = [0, 0], sizes = [16, 1], strides = [1, 1]} : vector<16x128xf32> to vector<16x1xf32>
    %138 = vector.extract_strided_slice %130 {offsets = [0, 0], sizes = [16, 1], strides = [1, 1]} : vector<16x128xf32> to vector<16x1xf32>
    %139 = vector.extract_strided_slice %133 {offsets = [0, 0], sizes = [16, 1], strides = [1, 1]} : vector<16x128xf32> to vector<16x1xf32>
    %140 = vector.extract_strided_slice %136 {offsets = [0, 0], sizes = [16, 1], strides = [1, 1]} : vector<16x128xf32> to vector<16x1xf32>
    %141 = vector.extract_strided_slice %137 {offsets = [0, 0], sizes = [8, 1], strides = [1, 1]} : vector<16x1xf32> to vector<8x1xf32>
    %142 = vector.extract_strided_slice %137 {offsets = [8, 0], sizes = [8, 1], strides = [1, 1]} : vector<16x1xf32> to vector<8x1xf32>
    %143 = vector.extract_strided_slice %138 {offsets = [0, 0], sizes = [8, 1], strides = [1, 1]} : vector<16x1xf32> to vector<8x1xf32>
    %144 = vector.extract_strided_slice %138 {offsets = [8, 0], sizes = [8, 1], strides = [1, 1]} : vector<16x1xf32> to vector<8x1xf32>
    %145 = vector.extract_strided_slice %139 {offsets = [0, 0], sizes = [8, 1], strides = [1, 1]} : vector<16x1xf32> to vector<8x1xf32>
    %146 = vector.extract_strided_slice %139 {offsets = [8, 0], sizes = [8, 1], strides = [1, 1]} : vector<16x1xf32> to vector<8x1xf32>
    %147 = vector.extract_strided_slice %140 {offsets = [0, 0], sizes = [8, 1], strides = [1, 1]} : vector<16x1xf32> to vector<8x1xf32>
    %148 = vector.extract_strided_slice %140 {offsets = [8, 0], sizes = [8, 1], strides = [1, 1]} : vector<16x1xf32> to vector<8x1xf32>
    %c0_39 = arith.constant 0 : index
    %149 = memref.load %arg4[%c0_39] : memref<4xf32, #tpu.memory_space<smem>>
    %c1_40 = arith.constant 1 : index
    %150 = memref.load %arg4[%c1_40] : memref<4xf32, #tpu.memory_space<smem>>
    %c2_41 = arith.constant 2 : index
    %151 = memref.load %arg4[%c2_41] : memref<4xf32, #tpu.memory_space<smem>>
    %c3_42 = arith.constant 3 : index
    %152 = memref.load %arg4[%c3_42] : memref<4xf32, #tpu.memory_space<smem>>
    %153 = vector.broadcast %149 : f32 to vector<8x1xf32>
    %154 = arith.mulf %153, %141 : vector<8x1xf32>
    %155 = vector.broadcast %150 : f32 to vector<8x1xf32>
    %156 = arith.mulf %155, %145 : vector<8x1xf32>
    %157 = arith.addf %154, %156 : vector<8x1xf32>
    %158 = vector.broadcast %149 : f32 to vector<8x1xf32>
    %159 = arith.mulf %158, %143 : vector<8x1xf32>
    %160 = vector.broadcast %150 : f32 to vector<8x1xf32>
    %161 = arith.mulf %160, %147 : vector<8x1xf32>
    %162 = arith.addf %159, %161 : vector<8x1xf32>
    %163 = vector.broadcast %151 : f32 to vector<8x1xf32>
    %164 = arith.mulf %142, %163 : vector<8x1xf32>
    %165 = vector.broadcast %152 : f32 to vector<8x1xf32>
    %166 = arith.mulf %144, %165 : vector<8x1xf32>
    %167 = arith.addf %164, %166 : vector<8x1xf32>
    %168 = vector.broadcast %151 : f32 to vector<8x1xf32>
    %169 = arith.mulf %146, %168 : vector<8x1xf32>
    %170 = vector.broadcast %152 : f32 to vector<8x1xf32>
    %171 = arith.mulf %148, %170 : vector<8x1xf32>
    %172 = arith.addf %169, %171 : vector<8x1xf32>
    %173 = arith.mulf %157, %167 : vector<8x1xf32>
    %c0_43 = arith.constant 0 : index
    %c0_44 = arith.constant 0 : index
    %c0_45 = arith.constant 0 : index
    %174 = vector.load %arg3[%c0_43, %c0_44, %c0_45] : memref<4x8x128xf32, #tpu.memory_space<vmem>>, vector<1x8x128xf32>
    %175 = vector.shape_cast %174 : vector<1x8x128xf32> to vector<8x128xf32>
    %176 = vector.broadcast %173 : vector<8x1xf32> to vector<8x128xf32>
    %177 = arith.mulf %176, %175 : vector<8x128xf32>
    %178 = arith.mulf %157, %172 : vector<8x1xf32>
    %c1_46 = arith.constant 1 : index
    %c0_47 = arith.constant 0 : index
    %c0_48 = arith.constant 0 : index
    %179 = vector.load %arg3[%c1_46, %c0_47, %c0_48] : memref<4x8x128xf32, #tpu.memory_space<vmem>>, vector<1x8x128xf32>
    %180 = vector.shape_cast %179 : vector<1x8x128xf32> to vector<8x128xf32>
    %181 = vector.broadcast %178 : vector<8x1xf32> to vector<8x128xf32>
    %182 = arith.mulf %181, %180 : vector<8x128xf32>
    %183 = arith.addf %177, %182 : vector<8x128xf32>
    %184 = arith.mulf %162, %167 : vector<8x1xf32>
    %c2_49 = arith.constant 2 : index
    %c0_50 = arith.constant 0 : index
    %c0_51 = arith.constant 0 : index
    %185 = vector.load %arg3[%c2_49, %c0_50, %c0_51] : memref<4x8x128xf32, #tpu.memory_space<vmem>>, vector<1x8x128xf32>
    %186 = vector.shape_cast %185 : vector<1x8x128xf32> to vector<8x128xf32>
    %187 = vector.broadcast %184 : vector<8x1xf32> to vector<8x128xf32>
    %188 = arith.mulf %187, %186 : vector<8x128xf32>
    %189 = arith.addf %183, %188 : vector<8x128xf32>
    %190 = arith.mulf %162, %172 : vector<8x1xf32>
    %c3_52 = arith.constant 3 : index
    %c0_53 = arith.constant 0 : index
    %c0_54 = arith.constant 0 : index
    %191 = vector.load %arg3[%c3_52, %c0_53, %c0_54] : memref<4x8x128xf32, #tpu.memory_space<vmem>>, vector<1x8x128xf32>
    %192 = vector.shape_cast %191 : vector<1x8x128xf32> to vector<8x128xf32>
    %193 = vector.broadcast %190 : vector<8x1xf32> to vector<8x128xf32>
    %194 = arith.mulf %193, %192 : vector<8x128xf32>
    %195 = arith.addf %189, %194 : vector<8x128xf32>
    %c0_55 = arith.constant 0 : index
    %c0_56 = arith.constant 0 : index
    %196 = vector.load %arg5[%c0_55, %c0_56] : memref<8x128xf32, #tpu.memory_space<vmem>>, vector<8x128xf32>
    tpu.vector_store %arg5[%c0_55, %c0_56], %195 {strides = array<i32>} : memref<8x128xf32, #tpu.memory_space<vmem>>, vector<8x128xf32>,
    return
  }
  func.func @transform_0(%arg0: i32) -> (i32, i32) {
    %c0_i32 = arith.constant 0 : i32
    %c0_i32_0 = arith.constant 0 : i32
    %c0_i32_1 = arith.constant 0 : i32
    return %c0_i32, %c0_i32_0 : i32, i32
  }
  func.func @transform_1(%arg0: i32) -> (i32, i32, i32) {
    %c0_i32 = arith.constant 0 : i32
    %c0_i32_0 = arith.constant 0 : i32
    %c0_i32_1 = arith.constant 0 : i32
    %c0_i32_2 = arith.constant 0 : i32
    return %c0_i32, %c0_i32_0, %c0_i32_1 : i32, i32, i32
  }
  func.func @transform_2(%arg0: i32) -> (i32, i32, i32) {
    %c0_i32 = arith.constant 0 : i32
    %c0_i32_0 = arith.constant 0 : i32
    %c0_i32_1 = arith.constant 0 : i32
    %c0_i32_2 = arith.constant 0 : i32
    return %c0_i32, %c0_i32_0, %c0_i32_1 : i32, i32, i32
  }
  func.func @transform_3(%arg0: i32) -> i32 {
    %c0_i32 = arith.constant 0 : i32
    %c0_i32_0 = arith.constant 0 : i32
    return %c0_i32 : i32
  }
  func.func @transform_4(%arg0: i32) -> (i32, i32) {
    %c0_i32 = arith.constant 0 : i32
    %c0_i32_0 = arith.constant 0 : i32
    %c0_i32_1 = arith.constant 0 : i32
    return %c0_i32, %c0_i32_0 : i32, i32
  }
}

</mosaic_0001>

<bundles_post_ra>
// kernel: _forward.1
= control target key start
LH: loop header
LB: loop body
LE: loop exit
PB: predicated region body
PF: predicated region fallthrough
CT: control target
= control target key end

     0   :  { %9 = vsyncpa [#allocation4], 0  ;;  %s686_s0 = inlined_call_operand.vmem [shape: f32[16,128], index: 0, kind: input, shape index: {}]   ;;  %s687_s1 = inlined_call_operand.vmem [shape: f32[8,16,128], index: 1, kind: input, shape index: {}]   ;;  %s688_s2 = inlined_call_operand.vmem [shape: f32[4,8,128], index: 2, kind: input, shape index: {}]   ;;  %s689_s3 = inlined_call_operand.vmem [shape: f32[4], index: 3, kind: input, shape index: {}]   ;;  %s690_s4 = inlined_call_operand.hbm [shape: f32[8,128], index: 4, kind: output, shape index: {}]  }
   0x1   :  { %10 = vsyncpa [#allocation3], 0  ;;  %s22_s17 = sshll.u32 %s689_s3, 4  ;;  %s501_s18 = smov [#allocation2]   ;;  %s23_s17 = int_to_ptr.vmem [resolvable:$true] %s22_s17 }
   0x2   :  { %25 = dma.vmem_to_smem %s23_s17, 16, %s501_s18, [#allocation4]  }
   0x3   :  { %497 = dma.done.wait [#allocation4], 16  }
   0x4   :  { %498 = vsyncadd [#allocation4], 4294967280 }
   0x5   :  { %30 = sfence }
   0x6   :  { %v32_v0 = vld [vmem:[%s686_s0 + $0x8] sm:$0xff]  ;;  %v431_v1 = vld [vmem:[%s687_s1 + $0x18] sm:$0xff]  ;;  %v31_v4 = vld [vmem:[%s686_s0] sm:$0xff]  ;;  %s502_s11 = smov 64   ;;  %s503_s27 = smov 96  }
   0x7   :  { %v433_v2 = vld [vmem:[%s687_s1 + $0x58] sm:$0xff]  ;;  %v33_v5 = vld [vmem:[%s687_s1] sm:$0xff]  ;;  %v429_v10 = vld [vmem:[%s687_s1 + $0x48] sm:$0xff]  ;;  %s505_s28 = smov 120   ;;  %s506_s29 = smov 124  }
   0x8   :  { %v49_v3 = vmul.f32 %v433_v2, %v32_v0  ;;  %v428_v6 = vld [vmem:[%s687_s1 + $0x40] sm:$0xff]  ;;  %v435_v11 = vld [vmem:[%s687_s1 + $0x28] sm:$0xff]  ;;  %v441_v16 = vld [vmem:[%s687_s1 + $0x78] sm:$0xff]  ;;  %v39_v18 = vmul.f32 %v429_v10, %v32_v0  ;;  %s507_s30 = smov 126   ;;  %s508_s5 = smov 127  }
   0x9   :  { %v38_v7 = vmul.f32 %v428_v6, %v31_v4  ;;  %v436_v8 = vld [vmem:[%s687_s1 + $0x60] sm:$0xff]  ;;  %v437_v12 = vld [vmem:[%s687_s1 + $0x68] sm:$0xff]  ;;  %v69_v21 = vmul.f32 %v441_v16, %v32_v0  ;;  %v439_v23 = vld [vmem:[%s687_s1 + $0x38] sm:$0xff]  ;;  %s661_s6 = sld [smem:[#allocation2]]  ;;  %s510_s17 = smov [#allocation5]  }
   0xa   :  { %v51_v9 = vadd.f32 %v431_v1, %v49_v3  ;;  %v59_v14 = vmul.f32 %v437_v12, %v32_v0  ;;  %v58_v15 = vmul.f32 %v436_v8, %v31_v4  ;;  %v434_v17 = vld [vmem:[%s687_s1 + $0x20] sm:$0xff]  ;;  %v34_v20 = vld [vmem:[%s687_s1 + $0x8] sm:$0xff]  ;;  %v440_v25 = vld [vmem:[%s687_s1 + $0x70] sm:$0xff]  ;;  %s663_s7 = sld [smem:[#allocation2 + $0x1]]  ;;  %s416_s18 = sshll.u32 %s510_s17, 4  ;;  %s417_s18 = int_to_ptr.vmem [resolvable:$true] %s416_s18 }
   0xb   :  { %v569_v13 = vadd.f32 %v38_v7, %v33_v5  ;;  %v41_v24 = vadd.f32 %v39_v18, %v34_v20  ;;  %v432_v26 = vld [vmem:[%s687_s1 + $0x50] sm:$0xff]  ;;  %v71_v27 = vadd.f32 %v439_v23, %v69_v21  ;;  %v68_v28 = vmul.f32 %v440_v25, %v31_v4  ;;  %s444_s8 = sld [smem:[#allocation2 + $0x3]]  ;;  %s418_s21 = sshll.u32 %s690_s4, 4  ;;  %s419_s21 = int_to_ptr.hbm [resolvable:$true] %s418_s21 }
   0xc   :  { %78 = vrot.lane.b32.xlu1 %v51_v9, %s502_s11  ;;  %v61_v19 = vadd.f32 %v435_v11, %v59_v14  ;;  %v60_v22 = vadd.f32 %v434_v17, %v58_v15  ;;  %v438_v29 = vld [vmem:[%s687_s1 + $0x30] sm:$0xff]  ;;  %v48_v30 = vmul.f32 %v432_v26, %v31_v4  ;;  %s443_s0 = sld [smem:[#allocation2 + $0x2]] }
   0xd   :  { %72 = vrot.lane.b32.xlu0 %v569_v13, %s502_s11  ;;  %v430_v31 = vld [vmem:[%s687_s1 + $0x10] sm:$0xff]  ;;  %v70_v32 = vadd.f32 %v438_v29, %v68_v28  ;;  %s504_s1 = smov 112  }
   0xe   :  { %82 = vrot.lane.b32.xlu2 %v61_v19, %s502_s11  ;;  %v50_v33 = vadd.f32 %v430_v31, %v48_v30 }
  0x14   :  { %80 = vrot.lane.b32.xlu1 %v60_v22, %s502_s11 }
  0x15   :  { %74 = vrot.lane.b32.xlu0 %v41_v24, %s502_s11 }
  0x16   :  { %86 = vrot.lane.b32.xlu2 %v71_v27, %s502_s11 }
  0x1c   :  { %84 = vrot.lane.b32.xlu1 %v70_v32, %s502_s11 }
  0x1d   :  { %76 = vrot.lane.b32.xlu0 %v50_v33, %s502_s11 }
  0x68   :  { %v83_v34 = vpop.permute.xlu2 %82 }
  0x69   :  { %v91_v43 = vmul.f32 %v83_v34, %v51_v9  ;;  %v103_v53 = vmul.f32 %v83_v34, %v71_v27 }
  0x70   :  { %v87_v35 = vpop.permute.xlu2 %86 }
  0x71   :  { %v97_v36 = vmul.f32 %v87_v35, %v51_v9  ;;  %v109_v41 = vmul.f32 %v87_v35, %v71_v27 }
  0x7e   :  { %v79_v37 = vpop.permute.xlu1 %78 }
  0x7f   :  { %v95_v38 = vmul.f32 %v79_v37, %v41_v24  ;;  %v73_v39 = vpop.permute.xlu0 %72  ;;  %v107_v42 = vmul.f32 %v79_v37, %v61_v19 }
  0x80   :  { %v88_v46 = vmul.f32 %v73_v39, %v569_v13  ;;  %v100_v55 = vmul.f32 %v73_v39, %v60_v22 }
  0x81   :  { %v99_v40 = vadd.f32 %v97_v36, %v95_v38  ;;  %v111_v45 = vadd.f32 %v109_v41, %v107_v42 }
  0x83   :  { %118 = vrot.lane.b32.xlu1 %v99_v40, %s503_s27 }
  0x86   :  { %v81_v44 = vpop.permute.xlu1 %80 }
  0x87   :  { %v90_v47 = vmul.f32 %v81_v44, %v50_v33  ;;  %v75_v48 = vpop.permute.xlu0 %74  ;;  %v102_v52 = vmul.f32 %v81_v44, %v70_v32 }
  0x88   :  { %v89_v49 = vmul.f32 %v75_v48, %v41_v24  ;;  %v101_v54 = vmul.f32 %v75_v48, %v61_v19 }
  0x89   :  { %v92_v50 = vadd.f32 %v90_v47, %v88_v46  ;;  %v104_v58 = vadd.f32 %v102_v52, %v100_v55 }
  0x8a   :  { %v93_v51 = vadd.f32 %v91_v43, %v89_v49  ;;  %v105_v59 = vadd.f32 %v103_v53, %v101_v54 }
  0x8b   :  { %126 = vrot.lane.b32.xlu1 %v111_v45, %s503_s27  ;;  %112 = vrot.lane.b32.xlu2 %v92_v50, %s503_s27 }
  0x8c   :  { %114 = vrot.lane.b32.xlu0 %v93_v51, %s503_s27 }
  0x8e   :  { %v85_v56 = vpop.permute.xlu1 %84 }
  0x8f   :  { %v77_v57 = vpop.permute.xlu0 %76  ;;  %v96_v60 = vmul.f32 %v85_v56, %v50_v33  ;;  %v108_v62 = vmul.f32 %v85_v56, %v70_v32 }
  0x90   :  { %v94_v61 = vmul.f32 %v77_v57, %v569_v13  ;;  %v106_v63 = vmul.f32 %v77_v57, %v60_v22 }
  0x92   :  { %v98_v0 = vadd.f32 %v96_v60, %v94_v61  ;;  %v110_v1 = vadd.f32 %v108_v62, %v106_v63 }
  0x93   :  { %120 = vrot.lane.b32.xlu2 %v104_v58, %s503_s27 }
  0x94   :  { %122 = vrot.lane.b32.xlu0 %v105_v59, %s503_s27 }
  0x9b   :  { %116 = vrot.lane.b32.xlu2 %v98_v0, %s503_s27 }
  0x9c   :  { %124 = vrot.lane.b32.xlu0 %v110_v1, %s503_s27 }
  0xe5   :  { %v113_v2 = vpop.permute.xlu2 %112 }
  0xe6   :  { %v128_v4 = vmul.f32 %v113_v2, %v92_v50  ;;  %v140_v9 = vmul.f32 %v113_v2, %v104_v58 }
  0xed   :  { %v121_v3 = vpop.permute.xlu2 %120 }
  0xee   :  { %v130_v5 = vmul.f32 %v121_v3, %v98_v0  ;;  %v142_v7 = vmul.f32 %v121_v3, %v110_v1 }
  0xf0   :  { %v606_v6 = vadd.f32 %v130_v5, %v128_v4  ;;  %v610_v10 = vadd.f32 %v142_v7, %v140_v9 }
  0xf2   :  { %152 = vrot.lane.b32.xlu1 %v606_v6, %s504_s1 }
  0xf5   :  { %v119_v8 = vpop.permute.xlu1 %118  ;;  %v117_v23 = vpop.permute.xlu2 %116 }
  0xf6   :  { %v135_v12 = vmul.f32 %v119_v8, %v93_v51  ;;  %v147_v17 = vmul.f32 %v119_v8, %v105_v59  ;;  %v134_v26 = vmul.f32 %v117_v23, %v92_v50  ;;  %v146_v32 = vmul.f32 %v117_v23, %v104_v58 }
  0xfa   :  { %160 = vrot.lane.b32.xlu1 %v610_v10, %s504_s1 }
  0xfd   :  { %v127_v11 = vpop.permute.xlu1 %126 }
  0xfe   :  { %v137_v13 = vmul.f32 %v127_v11, %v99_v40  ;;  %v115_v14 = vpop.permute.xlu0 %114  ;;  %v149_v16 = vmul.f32 %v127_v11, %v111_v45 }
  0xff   :  { %v129_v19 = vmul.f32 %v115_v14, %v93_v51  ;;  %v141_v27 = vmul.f32 %v115_v14, %v105_v59 }
 0x100   :  { %v139_v15 = vadd.f32 %v137_v13, %v135_v12  ;;  %v151_v21 = vadd.f32 %v149_v16, %v147_v17 }
 0x102   :  { %158 = vrot.lane.b32.xlu0 %v139_v15, %s504_s1 }
 0x106   :  { %v123_v18 = vpop.permute.xlu0 %122 }
 0x107   :  { %v131_v20 = vmul.f32 %v123_v18, %v99_v40  ;;  %v143_v24 = vmul.f32 %v123_v18, %v111_v45 }
 0x109   :  { %v133_v22 = vadd.f32 %v131_v20, %v129_v19  ;;  %v145_v29 = vadd.f32 %v143_v24, %v141_v27 }
 0x10a   :  { %166 = vrot.lane.b32.xlu0 %v151_v21, %s504_s1 }
 0x10b   :  { %154 = vrot.lane.b32.xlu2 %v133_v22, %s504_s1 }
 0x10e   :  { %v125_v25 = vpop.permute.xlu0 %124 }
 0x10f   :  { %v136_v28 = vmul.f32 %v125_v25, %v98_v0  ;;  %v148_v31 = vmul.f32 %v125_v25, %v110_v1 }
 0x111   :  { %v138_v30 = vadd.f32 %v136_v28, %v134_v26  ;;  %v150_v33 = vadd.f32 %v148_v31, %v146_v32 }
 0x113   :  { %162 = vrot.lane.b32.xlu2 %v145_v29, %s504_s1  ;;  %156 = vrot.lane.b32.xlu1 %v138_v30, %s504_s1 }
 0x11b   :  { %164 = vrot.lane.b32.xlu2 %v150_v33, %s504_s1 }
 0x164   :  { %v153_v34 = vpop.permute.xlu1 %152 }
 0x165   :  { %v155_v35 = vpop.permute.xlu2 %154  ;;  %v168_v37 = vmul.f32 %v153_v34, %v606_v6  ;;  %v180_v47 = vmul.f32 %v153_v34, %v610_v10 }
 0x166   :  { %v169_v40 = vmul.f32 %v155_v35, %v133_v22  ;;  %v181_v48 = vmul.f32 %v155_v35, %v145_v29 }
 0x16c   :  { %v161_v36 = vpop.permute.xlu1 %160 }
 0x16d   :  { %v170_v38 = vmul.f32 %v161_v36, %v138_v30  ;;  %v163_v39 = vpop.permute.xlu2 %162  ;;  %v182_v44 = vmul.f32 %v161_v36, %v150_v33 }
 0x16e   :  { %v171_v41 = vmul.f32 %v163_v39, %v139_v15  ;;  %v183_v45 = vmul.f32 %v163_v39, %v151_v21 }
 0x16f   :  { %v621_v42 = vadd.f32 %v170_v38, %v168_v37  ;;  %v184_v49 = vadd.f32 %v182_v44, %v180_v47 }
 0x170   :  { %v173_v43 = vadd.f32 %v171_v41, %v169_v40  ;;  %v185_v50 = vadd.f32 %v183_v45, %v181_v48 }
 0x171   :  { %192 = vrot.lane.b32.xlu0 %v621_v42, %s505_s28 }
 0x172   :  { %194 = vrot.lane.b32.xlu1 %v173_v43, %s505_s28 }
 0x174   :  { %v159_v46 = vpop.permute.xlu0 %158 }
 0x175   :  { %v175_v52 = vmul.f32 %v159_v46, %v133_v22  ;;  %v165_v55 = vpop.permute.xlu2 %164  ;;  %v187_v57 = vmul.f32 %v159_v46, %v145_v29 }
 0x176   :  { %v176_v59 = vmul.f32 %v165_v55, %v138_v30  ;;  %v188_v60 = vmul.f32 %v165_v55, %v150_v33 }
 0x179   :  { %200 = vrot.lane.b32.xlu0 %v184_v49, %s505_s28 }
 0x17a   :  { %202 = vrot.lane.b32.xlu1 %v185_v50, %s505_s28 }
 0x17c   :  { %v167_v51 = vpop.permute.xlu0 %166 }
 0x17d   :  { %v177_v53 = vmul.f32 %v167_v51, %v139_v15  ;;  %v189_v56 = vmul.f32 %v167_v51, %v151_v21 }
 0x17f   :  { %v179_v54 = vadd.f32 %v177_v53, %v175_v52  ;;  %v191_v63 = vadd.f32 %v189_v56, %v187_v57 }
 0x181   :  { %198 = vrot.lane.b32.xlu2 %v179_v54, %s505_s28 }
 0x185   :  { %v157_v58 = vpop.permute.xlu1 %156 }
 0x186   :  { %v174_v61 = vmul.f32 %v157_v58, %v606_v6  ;;  %v186_v62 = vmul.f32 %v157_v58, %v610_v10 }
 0x188   :  { %v178_v0 = vadd.f32 %v176_v59, %v174_v61  ;;  %v190_v1 = vadd.f32 %v188_v60, %v186_v62 }
 0x189   :  { %206 = vrot.lane.b32.xlu2 %v191_v63, %s505_s28 }
 0x18a   :  { %204 = vrot.lane.b32.xlu1 %v190_v1, %s505_s28  ;;  %196 = vrot.lane.b32.xlu0 %v178_v0, %s505_s28 }
 0x1db   :  { %v199_v2 = vpop.permute.xlu2 %198 }
 0x1dc   :  { %v215_v5 = vmul.f32 %v199_v2, %v173_v43  ;;  %v227_v12 = vmul.f32 %v199_v2, %v185_v50 }
 0x1e3   :  { %v207_v3 = vpop.permute.xlu2 %206  ;;  %v193_v4 = vpop.permute.xlu0 %192 }
 0x1e4   :  { %v195_v7 = vpop.permute.xlu1 %194  ;;  %v217_v8 = vmul.f32 %v207_v3, %v179_v54  ;;  %v229_v11 = vmul.f32 %v207_v3, %v191_v63  ;;  %v208_v10 = vmul.f32 %v193_v4, %v621_v42  ;;  %v220_v22 = vmul.f32 %v193_v4, %v184_v49 }
 0x1e5   :  { %v209_v15 = vmul.f32 %v195_v7, %v173_v43  ;;  %v221_v23 = vmul.f32 %v195_v7, %v185_v50 }
 0x1e6   :  { %v219_v9 = vadd.f32 %v217_v8, %v215_v5  ;;  %v231_v17 = vadd.f32 %v229_v11, %v227_v12 }
 0x1e8   :  { %238 = vrot.lane.b32.xlu1 %v219_v9, %s506_s29 }
 0x1eb   :  { %v201_v6 = vpop.permute.xlu0 %200 }
 0x1ec   :  { %v203_v13 = vpop.permute.xlu1 %202  ;;  %v210_v14 = vmul.f32 %v201_v6, %v178_v0  ;;  %v222_v20 = vmul.f32 %v201_v6, %v190_v1 }
 0x1ed   :  { %v211_v16 = vmul.f32 %v203_v13, %v179_v54  ;;  %v223_v21 = vmul.f32 %v203_v13, %v191_v63 }
 0x1ee   :  { %v212_v18 = vadd.f32 %v210_v14, %v208_v10  ;;  %v224_v24 = vadd.f32 %v222_v20, %v220_v22 }
 0x1ef   :  { %v213_v19 = vadd.f32 %v211_v16, %v209_v15  ;;  %v225_v25 = vadd.f32 %v223_v21, %v221_v23 }
 0x1f0   :  { %246 = vrot.lane.b32.xlu1 %v231_v17, %s506_s29  ;;  %232 = vrot.lane.b32.xlu2 %v212_v18, %s506_s29 }
 0x1f1   :  { %234 = vrot.lane.b32.xlu0 %v213_v19, %s506_s29 }
 0x1f8   :  { %240 = vrot.lane.b32.xlu2 %v224_v24, %s506_s29 }
 0x1f9   :  { %242 = vrot.lane.b32.xlu0 %v225_v25, %s506_s29 }
 0x1fc   :  { %v205_v26 = vpop.permute.xlu1 %204  ;;  %v197_v27 = vpop.permute.xlu0 %196 }
 0x1fd   :  { %v216_v28 = vmul.f32 %v205_v26, %v178_v0  ;;  %v228_v29 = vmul.f32 %v205_v26, %v190_v1  ;;  %v214_v30 = vmul.f32 %v197_v27, %v621_v42  ;;  %v226_v31 = vmul.f32 %v197_v27, %v184_v49 }
 0x1ff   :  { %v218_v32 = vadd.f32 %v216_v28, %v214_v30  ;;  %v230_v33 = vadd.f32 %v228_v29, %v226_v31 }
 0x201   :  { %244 = vrot.lane.b32.xlu0 %v230_v33, %s506_s29  ;;  %236 = vrot.lane.b32.xlu2 %v218_v32, %s506_s29 }
 0x24a   :  { %v233_v34 = vpop.permute.xlu2 %232 }
 0x24b   :  { %v248_v36 = vmul.f32 %v233_v34, %v212_v18  ;;  %v260_v41 = vmul.f32 %v233_v34, %v224_v24  ;;  %v509_v34 = vmov 0  }
 0x24c   :  { %459 = vset.pattern.permute.xlu0 %v509_v34  ;;  %458 = vset.pattern.permute.xlu2 %v509_v34 }
 0x24d   :  { %460 = vset.pattern.permute.xlu1 %v509_v34 }
 0x252   :  { %v241_v35 = vpop.permute.xlu2 %240 }
 0x253   :  { %v250_v37 = vmul.f32 %v241_v35, %v218_v32  ;;  %v262_v39 = vmul.f32 %v241_v35, %v230_v33 }
 0x255   :  { %v637_v38 = vadd.f32 %v250_v37, %v248_v36  ;;  %v641_v42 = vadd.f32 %v262_v39, %v260_v41  ;;  %v356_v41 = vstv %s661_s6 }
 0x257   :  { %272 = vrot.lane.b32.xlu1 %v637_v38, %s507_s30 }
 0x25a   :  { %v239_v40 = vpop.permute.xlu1 %238 }
 0x25b   :  { %v255_v44 = vmul.f32 %v239_v40, %v213_v19  ;;  %v267_v49 = vmul.f32 %v239_v40, %v225_v25  ;;  %v237_v55 = vpop.permute.xlu2 %236 }
 0x25c   :  { %v254_v58 = vmul.f32 %v237_v55, %v212_v18  ;;  %v266_v0 = vmul.f32 %v237_v55, %v224_v24 }
 0x25f   :  { %280 = vrot.lane.b32.xlu1 %v641_v42, %s507_s30 }
 0x262   :  { %v247_v43 = vpop.permute.xlu1 %246 }
 0x263   :  { %v257_v45 = vmul.f32 %v247_v43, %v219_v9  ;;  %v235_v46 = vpop.permute.xlu0 %234  ;;  %v269_v48 = vmul.f32 %v247_v43, %v231_v17 }
 0x264   :  { %v249_v51 = vmul.f32 %v235_v46, %v213_v19  ;;  %v261_v59 = vmul.f32 %v235_v46, %v225_v25 }
 0x265   :  { %v259_v47 = vadd.f32 %v257_v45, %v255_v44  ;;  %v271_v53 = vadd.f32 %v269_v48, %v267_v49 }
 0x267   :  { %278 = vrot.lane.b32.xlu0 %v259_v47, %s507_s30 }
 0x26b   :  { %v243_v50 = vpop.permute.xlu0 %242 }
 0x26c   :  { %v251_v52 = vmul.f32 %v243_v50, %v219_v9  ;;  %v263_v56 = vmul.f32 %v243_v50, %v231_v17 }
 0x26e   :  { %v253_v54 = vadd.f32 %v251_v52, %v249_v51  ;;  %v265_v61 = vadd.f32 %v263_v56, %v261_v59 }
 0x26f   :  { %286 = vrot.lane.b32.xlu0 %v271_v53, %s507_s30 }
 0x270   :  { %274 = vrot.lane.b32.xlu2 %v253_v54, %s507_s30 }
 0x273   :  { %v245_v57 = vpop.permute.xlu0 %244 }
 0x274   :  { %v256_v60 = vmul.f32 %v245_v57, %v218_v32  ;;  %v268_v63 = vmul.f32 %v245_v57, %v230_v33  ;;  %v366_v57 = vstv %s444_s8 }
 0x276   :  { %v258_v62 = vadd.f32 %v256_v60, %v254_v58  ;;  %v270_v1 = vadd.f32 %v268_v63, %v266_v0  ;;  %v364_v58 = vstv %s443_s0 }
 0x278   :  { %282 = vrot.lane.b32.xlu2 %v265_v61, %s507_s30  ;;  %276 = vrot.lane.b32.xlu1 %v258_v62, %s507_s30 }
 0x280   :  { %284 = vrot.lane.b32.xlu2 %v270_v1, %s507_s30 }
 0x2c9   :  { %v273_v2 = vpop.permute.xlu1 %272 }
 0x2ca   :  { %v275_v3 = vpop.permute.xlu2 %274  ;;  %v288_v5 = vmul.f32 %v273_v2, %v637_v38  ;;  %v300_v15 = vmul.f32 %v273_v2, %v641_v42 }
 0x2cb   :  { %v289_v9 = vmul.f32 %v275_v3, %v253_v54  ;;  %v301_v16 = vmul.f32 %v275_v3, %v265_v61 }
 0x2d1   :  { %v281_v4 = vpop.permute.xlu1 %280 }
 0x2d2   :  { %v290_v7 = vmul.f32 %v281_v4, %v258_v62  ;;  %v283_v8 = vpop.permute.xlu2 %282  ;;  %v302_v10 = vmul.f32 %v281_v4, %v270_v1 }
 0x2d3   :  { %v291_v11 = vmul.f32 %v283_v8, %v259_v47  ;;  %v303_v13 = vmul.f32 %v283_v8, %v271_v53 }
 0x2d4   :  { %v652_v6 = vadd.f32 %v290_v7, %v288_v5  ;;  %v656_v17 = vadd.f32 %v302_v10, %v300_v15 }
 0x2d5   :  { %v293_v12 = vadd.f32 %v291_v11, %v289_v9  ;;  %v305_v18 = vadd.f32 %v303_v13, %v301_v16 }
 0x2d6   :  { %312 = vrot.lane.b32.xlu0 %v652_v6, %s508_s5 }
 0x2d7   :  { %314 = vrot.lane.b32.xlu1 %v293_v12, %s508_s5 }
 0x2d9   :  { %v279_v14 = vpop.permute.xlu0 %278 }
 0x2da   :  { %v295_v20 = vmul.f32 %v279_v14, %v253_v54  ;;  %v285_v23 = vpop.permute.xlu2 %284  ;;  %v307_v25 = vmul.f32 %v279_v14, %v265_v61 }
 0x2db   :  { %v296_v27 = vmul.f32 %v285_v23, %v258_v62  ;;  %v308_v28 = vmul.f32 %v285_v23, %v270_v1 }
 0x2de   :  { %320 = vrot.lane.b32.xlu0 %v656_v17, %s508_s5 }
 0x2df   :  { %322 = vrot.lane.b32.xlu1 %v305_v18, %s508_s5 }
 0x2e1   :  { %v287_v19 = vpop.permute.xlu0 %286 }
 0x2e2   :  { %v297_v21 = vmul.f32 %v287_v19, %v259_v47  ;;  %v309_v24 = vmul.f32 %v287_v19, %v271_v53 }
 0x2e4   :  { %v299_v22 = vadd.f32 %v297_v21, %v295_v20  ;;  %v311_v31 = vadd.f32 %v309_v24, %v307_v25 }
 0x2e6   :  { %318 = vrot.lane.b32.xlu2 %v299_v22, %s508_s5 }
 0x2ea   :  { %v277_v26 = vpop.permute.xlu1 %276 }
 0x2eb   :  { %v294_v29 = vmul.f32 %v277_v26, %v637_v38  ;;  %v306_v30 = vmul.f32 %v277_v26, %v641_v42  ;;  %v358_v42 = vstv %s663_s7  ;;  %v445_v26 = vld [vmem:[%s688_s2 + $0x8] sm:$0xff] }
 0x2ed   :  { %v298_v32 = vadd.f32 %v296_v27, %v294_v29  ;;  %v310_v33 = vadd.f32 %v308_v28, %v306_v30  ;;  %v446_v28 = vld [vmem:[%s688_s2 + $0x10] sm:$0xff]  ;;  %v447_v30 = vld [vmem:[%s688_s2 + $0x18] sm:$0xff] }
 0x2ee   :  { %326 = vrot.lane.b32.xlu2 %v311_v31, %s508_s5 }
 0x2ef   :  { %324 = vrot.lane.b32.xlu1 %v310_v33, %s508_s5  ;;  %316 = vrot.lane.b32.xlu0 %v298_v32, %s508_s5 }
 0x340   :  { %v319_v35 = vpop.permute.xlu2 %318 }
 0x341   :  { %v335_v43 = vmul.f32 %v319_v35, %v293_v12  ;;  %v347_v44 = vmul.f32 %v319_v35, %v305_v18 }
 0x348   :  { %v313_v36 = vpop.permute.xlu0 %312  ;;  %v327_v38 = vpop.permute.xlu2 %326 }
 0x349   :  { %v315_v37 = vpop.permute.xlu1 %314  ;;  %v337_v39 = vmul.f32 %v327_v38, %v299_v22  ;;  %v349_v40 = vmul.f32 %v327_v38, %v311_v31  ;;  %v328_v45 = vmul.f32 %v313_v36, %v652_v6  ;;  %v340_v46 = vmul.f32 %v313_v36, %v656_v17 }
 0x34a   :  { %v329_v48 = vmul.f32 %v315_v37, %v293_v12  ;;  %v341_v49 = vmul.f32 %v315_v37, %v305_v18 }
 0x34b   :  { %v339_v53 = vadd.f32 %v337_v39, %v335_v43  ;;  %v351_v54 = vadd.f32 %v349_v40, %v347_v44 }
 0x34d   :  { %v367_v1 = vmul.f32 %v366_v57, %v339_v53  ;;  %v370_v2 = vmul.f32 %v366_v57, %v351_v54 }
 0x350   :  { %v321_v47 = vpop.permute.xlu0 %320 }
 0x351   :  { %v323_v50 = vpop.permute.xlu1 %322  ;;  %v330_v51 = vmul.f32 %v321_v47, %v298_v32  ;;  %v342_v52 = vmul.f32 %v321_v47, %v310_v33 }
 0x352   :  { %v331_v55 = vmul.f32 %v323_v50, %v299_v22  ;;  %v343_v56 = vmul.f32 %v323_v50, %v311_v31 }
 0x353   :  { %v332_v59 = vadd.f32 %v330_v51, %v328_v45  ;;  %v344_v60 = vadd.f32 %v342_v52, %v340_v46 }
 0x354   :  { %v333_v61 = vadd.f32 %v331_v55, %v329_v48  ;;  %v345_v62 = vadd.f32 %v343_v56, %v341_v49 }
 0x355   :  { %v357_v63 = vmul.f32 %v356_v41, %v332_v59  ;;  %v359_v0 = vmul.f32 %v358_v42, %v344_v60 }
 0x356   :  { %v365_v3 = vmul.f32 %v364_v58, %v333_v61  ;;  %v369_v4 = vmul.f32 %v364_v58, %v345_v62 }
 0x357   :  { %v360_v5 = vadd.f32 %v359_v0, %v357_v63 }
 0x358   :  { %v371_v7 = vadd.f32 %v370_v2, %v369_v4  ;;  %v368_v8 = vadd.f32 %v367_v1, %v365_v3 }
 0x35a   :  { %v380_v9 = vmul.f32 %v371_v7, %v360_v5  ;;  %v372_v11 = vmul.f32 %v368_v8, %v360_v5 }
 0x35c   :  { %385 = vperm.xlu0 %459, %v380_v9   ;;  %376 = vperm.xlu2 %458, %v372_v11  }
 0x361   :  { %v325_v12 = vpop.permute.xlu1 %324  ;;  %v317_v10 = vpop.permute.xlu0 %316 }
 0x362   :  { %v336_v13 = vmul.f32 %v325_v12, %v298_v32  ;;  %v348_v14 = vmul.f32 %v325_v12, %v310_v33  ;;  %v334_v15 = vmul.f32 %v317_v10, %v652_v6  ;;  %v346_v16 = vmul.f32 %v317_v10, %v656_v17  ;;  %v373_v6 = vld [vmem:[%s688_s2] sm:$0xff] }
 0x364   :  { %v338_v18 = vadd.f32 %v336_v13, %v334_v15  ;;  %v350_v19 = vadd.f32 %v348_v14, %v346_v16 }
 0x366   :  { %v361_v20 = vmul.f32 %v356_v41, %v338_v18  ;;  %v362_v21 = vmul.f32 %v358_v42, %v350_v19 }
 0x368   :  { %v363_v22 = vadd.f32 %v362_v21, %v361_v20 }
 0x36a   :  { %v400_v23 = vmul.f32 %v371_v7, %v363_v22  ;;  %v390_v24 = vmul.f32 %v368_v8, %v363_v22 }
 0x36c   :  { %405 = vperm.xlu2 %458, %v400_v23   ;;  %395 = vperm.xlu1 %460, %v390_v24  }
 0x3b6   :  { %v377_v25 = vpop.permute.xlu2 %376 }
 0x3b7   :  { %v379_v29 = vmul.f32 %v377_v25, %v373_v6 }
 0x3c6   :  { %v406_v31 = vpop.permute.xlu2 %405 }
 0x3c7   :  { %v408_v35 = vmul.f32 %v447_v30, %v406_v31 }
 0x3ce   :  { %v386_v27 = vpop.permute.xlu0 %385 }
 0x3cf   :  { %v388_v17 = vmul.f32 %v445_v26, %v386_v27 }
 0x3d1   :  { %v389_v33 = vadd.f32 %v388_v17, %v379_v29 }
 0x3de   :  { %v396_v32 = vpop.permute.xlu1 %395 }
 0x3df   :  { %v398_v34 = vmul.f32 %v446_v28, %v396_v32 }
 0x3e1   :  { %v399_v36 = vadd.f32 %v398_v34, %v389_v33 }
 0x3e3   :  { %v409_v37 = vadd.f32 %v408_v35, %v399_v36 }
 0x3e5   :  { %410 = vst [vmem:[#allocation5] sm:$0xff] %v409_v37 }
 0x3e6   :  { %421 = dma.vmem_to_hbm [thread:$0]  %s417_s18, 128, %s419_s21, [#allocation3]  }
 0x3e7   :  { %499 = dma.done.wait [#allocation3], 128  }
 0x3e8   :  { %500 = vsyncadd [#allocation3], 4294967168 }
 0x3e9   :  { %426 = vsyncpa [#allocation3], 1 }
 0x3ea   :  { %427 = vsyncpa [#allocation4], 1 }

</bundles_post_ra>
